<compile_context>
chip_gen: v5e
topology: v5e:2x2
jax: 0.10.0
libtpu: 0.0.40
codegen_flags: <defaults>
</compile_context>

<pallas_src>
import functools

import numpy as np
import jax
import jax.numpy as jnp
from jax.experimental import pallas as pl
from jax.experimental.pallas import tpu as pltpu

LANE = 512                  # lane width for the flattened elementwise kernel
MAX_ROW_BLOCK = 1024        # 1024 x 512 x 4 B = 2 MiB per f32 operand block
MAX_LANE_TILE = 64 * 1024   # lane tile for channel-major kernels (~1-2 MiB/blk)
VMEM_LIMIT_BYTES = 48 * 1024 * 1024   # safe on v5e/v6e (128 MiB) and v7x (64 MiB)


def _round_up(n, m):
    return ((n + m - 1) // m) * m


def _compiler_params():
    # TODO(synk): on v7x, pltpu.CORE_PARALLEL on the tiled axis would shard
    # these memory-bound elementwise kernels across both TensorCores.
    return pltpu.CompilerParams(
        dimension_semantics=("parallel",),
        vmem_limit_bytes=VMEM_LIMIT_BYTES,
    )


# ----------------------------------------------------------------------------
# Pallas kernel 1: deformed grid vertices  (elementwise tanh + scale + add)
#   runs on a flattened, fully lane/sublane-dense (rows, LANE) view
# ----------------------------------------------------------------------------
def _deform_kernel(scale, gv_ref, d_ref, out_ref):
    # `scale` is a Python float baked in as a literal (no captured constants).
    out_ref[...] = gv_ref[...] + scale * jnp.tanh(d_ref[...])


def deform_grid(grid_vertices, deformation, scale):
    n = grid_vertices.shape[0]
    total = n * 3
    rows = max(8, _round_up((total + LANE - 1) // LANE, 8))
    row_block = min(MAX_ROW_BLOCK, rows)
    rows = _round_up(rows, row_block)
    padded = rows * LANE

    gv = jnp.pad(jnp.reshape(grid_vertices, (-1,)), (0, padded - total)).reshape(rows, LANE)
    df = jnp.pad(jnp.reshape(deformation, (-1,)), (0, padded - total)).reshape(rows, LANE)

    out = pl.pallas_call(
        functools.partial(_deform_kernel, float(scale)),
        out_shape=jax.ShapeDtypeStruct((rows, LANE), jnp.float32),
        grid=(rows // row_block,),
        in_specs=[pl.BlockSpec((row_block, LANE), lambda i: (i, 0)),
                  pl.BlockSpec((row_block, LANE), lambda i: (i, 0))],
        out_specs=pl.BlockSpec((row_block, LANE), lambda i: (i, 0)),
        compiler_params=_compiler_params(),
    )(gv, df)
    return out.reshape(-1)[:total].reshape(n, 3)


# ----------------------------------------------------------------------------
# Pallas kernel 2: per-tetrahedron occ_sum and tetindex (corner-major [4, T])
#   out row 0: occ_sum = occ0+occ1+occ2+occ3
#   out row 1: tetindex = occ0 + 2*occ1 + 4*occ2 + 8*occ3
# ----------------------------------------------------------------------------
def _occ_kernel(sdf_ref, out_ref):
    occ0 = (sdf_ref[0:1, :] > 0.0).astype(jnp.int32)
    occ1 = (sdf_ref[1:2, :] > 0.0).astype(jnp.int32)
    occ2 = (sdf_ref[2:3, :] > 0.0).astype(jnp.int32)
    occ3 = (sdf_ref[3:4, :] > 0.0).astype(jnp.int32)
    out_ref[0:1, :] = occ0 + occ1 + occ2 + occ3
    out_ref[1:2, :] = occ0 + 2 * occ1 + 4 * occ2 + 8 * occ3


def tet_occupancy(sdf_tet_t):
    # sdf_tet_t: (4, T) f32, corner-major
    T = sdf_tet_t.shape[1]
    tile = min(MAX_LANE_TILE, _round_up(max(T, 1), 128))
    padded = _round_up(max(T, 1), tile)
    x = jnp.pad(sdf_tet_t, ((0, 0), (0, padded - T)), constant_values=-1.0)

    out = pl.pallas_call(
        _occ_kernel,
        out_shape=jax.ShapeDtypeStruct((2, padded), jnp.int32),
        grid=(padded // tile,),
        in_specs=[pl.BlockSpec((4, tile), lambda i: (0, i))],
        out_specs=pl.BlockSpec((2, tile), lambda i: (0, i)),
        compiler_params=_compiler_params(),
    )(x)
    return out[0, :T], out[1, :T]


# ----------------------------------------------------------------------------
# Pallas kernel 3: edge interpolation on the isosurface (channel-major)
#   packed rows: 0-2 = p0, 3-5 = p1, 6 = s0, 7 = s1   (exactly 8 sublanes)
#   verts = p0 * (-s1 / (s0 - s1)) + p1 * (s0 / (s0 - s1))
# ----------------------------------------------------------------------------
def _interp_kernel(x_ref, out_ref):
    p0 = x_ref[0:3, :]
    p1 = x_ref[3:6, :]
    s0 = x_ref[6:7, :]
    s1 = x_ref[7:8, :]
    inv = 1.0 / (s0 - s1)          # exact reciprocal (vertex accuracy)
    out_ref[...] = p0 * ((-s1) * inv) + p1 * (s0 * inv)


def interp_edges(pos_t, sdf_flat, interp_v):
    # pos_t: (3, N) f32, sdf_flat: (N,) f32, interp_v: (Ni, 2) int32
    Ni = int(interp_v.shape[0])
    if Ni == 0:
        return jnp.zeros((0, 3), jnp.float32)
    tile = min(MAX_LANE_TILE, _round_up(Ni, 128))
    padded = _round_up(Ni, tile)
    pad = padded - Ni

    i0 = interp_v[:, 0]
    i1 = interp_v[:, 1]
    p0 = jnp.pad(pos_t[:, i0], ((0, 0), (0, pad)))
    p1 = jnp.pad(pos_t[:, i1], ((0, 0), (0, pad)))
    s0 = jnp.pad(sdf_flat[i0][None, :], ((0, 0), (0, pad)), constant_values=1.0)
    s1 = jnp.pad(sdf_flat[i1][None, :], ((0, 0), (0, pad)), constant_values=-1.0)
    packed = jnp.concatenate([p0, p1, s0, s1], axis=0)     # (8, padded)

    out = pl.pallas_call(
        _interp_kernel,
        out_shape=jax.ShapeDtypeStruct((3, padded), jnp.float32),
        grid=(padded // tile,),
        in_specs=[pl.BlockSpec((8, tile), lambda i: (0, i))],
        out_specs=pl.BlockSpec((3, tile), lambda i: (0, i)),
        compiler_params=_compiler_params(),
    )(packed)
    return jnp.transpose(out[:, :Ni])                      # (Ni, 3)


# ----------------------------------------------------------------------------
# Synthetic tetrahedral grid (replaces the .npz tets file)
# ----------------------------------------------------------------------------
def build_tet_grid(res):
    lin = np.linspace(-0.5, 0.5, res + 1, dtype=np.float32)
    xx, yy, zz = np.meshgrid(lin, lin, lin, indexing="ij")
    verts = np.stack([xx, yy, zz], -1).reshape(-1, 3).astype(np.float32)

    def vid(i, j, k):
        return (i * (res + 1) + j) * (res + 1) + k

    corner_offsets = [(0, 0, 0), (1, 0, 0), (0, 1, 0), (1, 1, 0),
                      (0, 0, 1), (1, 0, 1), (0, 1, 1), (1, 1, 1)]
    # Kuhn 6-tet decomposition of the unit cube along the 0-7 diagonal
    tet_corners = [(0, 1, 3, 7), (0, 1, 5, 7), (0, 2, 3, 7),
                   (0, 2, 6, 7), (0, 4, 5, 7), (0, 4, 6, 7)]
    tets = []
    for i in range(res):
        for j in range(res):
            for k in range(res):
                cids = [vid(i + di, j + dj, k + dk) for (di, dj, dk) in corner_offsets]
                for t in tet_corners:
                    tets.append([cids[c] for c in t])
    return verts, np.asarray(tets, dtype=np.int32)


# ----------------------------------------------------------------------------
# Module port
# ----------------------------------------------------------------------------
class MarchingTetrahedraHelperPallas:
    points_range = (0.0, 1.0)

    TRIANGLE_TABLE = np.asarray(
        [[-1, -1, -1, -1, -1, -1], [1, 0, 2, -1, -1, -1], [4, 0, 3, -1, -1, -1],
         [1, 4, 2, 1, 3, 4], [3, 1, 5, -1, -1, -1], [2, 3, 0, 2, 5, 3],
         [1, 4, 0, 1, 5, 4], [4, 2, 5, -1, -1, -1], [4, 5, 2, -1, -1, -1],
         [4, 1, 0, 4, 5, 1], [3, 2, 0, 3, 5, 2], [1, 3, 5, -1, -1, -1],
         [4, 1, 2, 4, 3, 1], [3, 0, 4, -1, -1, -1], [2, 0, 1, -1, -1, -1],
         [-1, -1, -1, -1, -1, -1]], dtype=np.int64)
    NUM_TRIANGLES_TABLE = np.asarray(
        [0, 1, 1, 2, 1, 2, 2, 1, 1, 2, 2, 1, 2, 1, 1, 0], dtype=np.int64)
    BASE_TET_EDGES = np.asarray([0, 1, 0, 2, 0, 3, 1, 2, 1, 3, 2, 3], dtype=np.int64)

    def __init__(self, resolution, vertices_np, indices_np):
        self.resolution = resolution
        self._grid_vertices = jnp.asarray(vertices_np, jnp.float32)
        self.indices = np.asarray(indices_np, dtype=np.int64)
        self._all_edges = None
        ci, bi = self._get_center_boundary_index(np.asarray(vertices_np))
        self.center_indices = ci
        self.boundary_indices = bi

    @staticmethod
    def _get_center_boundary_index(verts):
        magn = np.sum(verts ** 2, axis=-1)
        center_idx = int(np.argmin(magn))
        boundary_neg = verts == verts.max()
        boundary_pos = verts == verts.min()
        boundary = (boundary_pos | boundary_neg).astype(np.float32).sum(-1)
        boundary_idx = np.nonzero(boundary)[0]
        return center_idx, boundary_idx

    @property
    def grid_vertices(self):
        return self._grid_vertices

    @property
    def all_edges(self):
        if self._all_edges is None:
            e = self.indices[:, self.BASE_TET_EDGES].reshape(-1, 2)
            e = np.sort(e, axis=1)
            self._all_edges = np.unique(e, axis=0)
        return self._all_edges

    # ------------------------------------------------------------------
    def _forward(self, pos_nx3, sdf_n, tet_fx4):
        sdf_flat = jnp.reshape(sdf_n, (-1,))
        tet = jnp.asarray(tet_fx4, jnp.int32)

        # Pallas: per-tet occ_sum + tetindex (corner-major, lane-dense)
        sdf_tet_t = sdf_flat[tet.T]                       # (4, T)
        occ_sum, tetindex = tet_occupancy(sdf_tet_t)

        # ---- host-side dynamic-shape index bookkeeping (concrete arrays) ----
        # One batched device->host transfer instead of three separate syncs.
        # TODO(synk): torch.unique / boolean-mask compaction have data-dependent
        # output shapes and no static-shape Pallas equivalent; done on host.
        sdf_np, occ_sum_np, tetindex_np = jax.device_get((sdf_flat, occ_sum, tetindex))
        occ_n_np = sdf_np > 0
        tet_np = np.asarray(tet_fx4, dtype=np.int64)

        valid = (occ_sum_np > 0) & (occ_sum_np < 4)
        tet_valid = tet_np[valid]
        all_edges = tet_valid[:, self.BASE_TET_EDGES].reshape(-1, 2)
        order = (all_edges[:, 0] > all_edges[:, 1]).astype(np.int64)[:, None]
        a = np.take_along_axis(all_edges, order, axis=1)
        b = np.take_along_axis(all_edges, 1 - order, axis=1)
        sorted_edges = np.concatenate([a, b], axis=1)                 # (E, 2)
        unique_edges, idx_map = np.unique(sorted_edges, axis=0, return_inverse=True)
        idx_map = idx_map.reshape(-1)
        mask_edges = occ_n_np[unique_edges.reshape(-1)].reshape(-1, 2).sum(-1) == 1
        mapping = np.full((unique_edges.shape[0],), -1, dtype=np.int64)
        mapping[mask_edges] = np.arange(int(mask_edges.sum()), dtype=np.int64)
        idx_map = mapping[idx_map]
        interp_v = unique_edges[mask_edges]                           # (Ni, 2)

        # ---- hot path: edge interpolation (Pallas, packed channel-major) ----
        pos_t = jnp.transpose(pos_nx3)                                # (3, N)
        verts = interp_edges(pos_t, sdf_flat, jnp.asarray(interp_v, jnp.int32))

        # ---- faces via triangle table (host glue, dynamic sizes) ----
        idx_map6 = idx_map.reshape(-1, 6)
        ti_valid = tetindex_np.astype(np.int64)[valid]
        num_tri = self.NUM_TRIANGLES_TABLE[ti_valid]
        m1 = num_tri == 1
        m2 = num_tri == 2
        tt = self.TRIANGLE_TABLE
        f1 = np.take_along_axis(idx_map6[m1], tt[ti_valid[m1]][:, :3], axis=1).reshape(-1, 3)
        f2 = np.take_along_axis(idx_map6[m2], tt[ti_valid[m2]][:, :6], axis=1).reshape(-1, 3)
        faces = np.concatenate([f1, f2], axis=0).astype(np.int32)     # torch long -> int32
        return verts, jnp.asarray(faces)

    # ------------------------------------------------------------------
    def forward(self, level, deformation=None):
        if deformation is not None:
            scale = (self.points_range[1] - self.points_range[0]) / self.resolution
            grid_vertices = deform_grid(self._grid_vertices, deformation, scale)
        else:
            grid_vertices = self._grid_vertices
        v_pos, t_pos_idx = self._forward(grid_vertices, level, self.indices)
        mesh = dict(
            v_pos=v_pos,
            t_pos_idx=t_pos_idx,
            grid_vertices=grid_vertices,
            tet_edges=jnp.asarray(self.all_edges, jnp.int32),
            grid_level=level,
            grid_deformation=deformation,
        )
        return mesh


# ----------------------------------------------------------------------------
if __name__ == "__main__":
    resolution = 4
    verts_np, tets_np = build_tet_grid(resolution)            # 125 verts, 384 tets
    helper = MarchingTetrahedraHelperPallas(resolution, verts_np, tets_np)

    key = jax.random.PRNGKey(0)
    k1, k2 = jax.random.split(key)
    n_verts = verts_np.shape[0]
    level = jax.random.normal(k1, (n_verts, 1), jnp.float32)          # sdf values
    deformation = 0.1 * jax.random.normal(k2, (n_verts, 3), jnp.float32)

    mesh = helper.forward(level, deformation)
    jax.block_until_ready(mesh["v_pos"])
    jax.block_until_ready(mesh["t_pos_idx"])
    jax.block_until_ready(mesh["grid_vertices"])
    assert mesh["v_pos"].shape[1] == 3 and mesh["t_pos_idx"].shape[1] == 3
    print("KERNEL_OK")
</pallas_src>

<mosaic_0001>
module attributes {stable_mosaic.version = 11 : i64} {
  func.func @_deform_kernel(%arg0: i32, %arg1: memref<8x512xf32, #tpu.memory_space<vmem>>, %arg2: memref<8x512xf32, #tpu.memory_space<vmem>>, %arg3: memref<8x512xf32, #tpu.memory_space<vmem>>) attributes {dimension_semantics = [#tpu.dimension_semantics<parallel>], iteration_bounds = array<i64: 1>, scalar_prefetch = 0 : i64, scratch_operands = 0 : i64, tpu.core_type = #tpu.core_type<tc>, window_params = [{transform_indices = @transform_0, window_bounds = array<i64: 8, 512>}, {transform_indices = @transform_1, window_bounds = array<i64: 8, 512>}, {transform_indices = @transform_2, window_bounds = array<i64: 8, 512>}]} {
    %c0 = arith.constant 0 : index
    %c0_0 = arith.constant 0 : index
    %0 = vector.load %arg1[%c0, %c0_0] : memref<8x512xf32, #tpu.memory_space<vmem>>, vector<8x512xf32>
    %c0_1 = arith.constant 0 : index
    %c0_2 = arith.constant 0 : index
    %1 = vector.load %arg2[%c0_1, %c0_2] : memref<8x512xf32, #tpu.memory_space<vmem>>, vector<8x512xf32>
    %2 = math.tanh %1 : vector<8x512xf32>
    %cst = arith.constant 2.500000e-01 : f32
    %3 = vector.broadcast %cst : f32 to vector<8x512xf32>
    %4 = arith.mulf %3, %2 : vector<8x512xf32>
    %5 = arith.addf %0, %4 : vector<8x512xf32>
    %c0_3 = arith.constant 0 : index
    %c0_4 = arith.constant 0 : index
    %6 = vector.load %arg3[%c0_3, %c0_4] : memref<8x512xf32, #tpu.memory_space<vmem>>, vector<8x512xf32>
    tpu.vector_store %arg3[%c0_3, %c0_4], %5 {strides = array<i32>} : memref<8x512xf32, #tpu.memory_space<vmem>>, vector<8x512xf32>,
    return
  }
  func.func @transform_0(%arg0: i32) -> (i32, i32) {
    %c0_i32 = arith.constant 0 : i32
    %c0_i32_0 = arith.constant 0 : i32
    return %arg0, %c0_i32 : i32, i32
  }
  func.func @transform_1(%arg0: i32) -> (i32, i32) {
    %c0_i32 = arith.constant 0 : i32
    %c0_i32_0 = arith.constant 0 : i32
    return %arg0, %c0_i32 : i32, i32
  }
  func.func @transform_2(%arg0: i32) -> (i32, i32) {
    %c0_i32 = arith.constant 0 : i32
    %c0_i32_0 = arith.constant 0 : i32
    return %arg0, %c0_i32 : i32, i32
  }
}

</mosaic_0001>

<bundles_post_ra>
// kernel: tpu_custom_call.1
= control target key start
LH: loop header
LB: loop body
LE: loop exit
PB: predicated region body
PF: predicated region fallthrough
CT: control target
= control target key end

     0   :  { %7 = vsyncpa [#allocation3], 0  ;;  %s198_s0 = inlined_call_operand.hbm [shape: f32[8,512], index: 0, kind: input, shape index: {}]   ;;  %s199_s1 = inlined_call_operand.hbm [shape: f32[8,512], index: 1, kind: input, shape index: {}]   ;;  %s200_s2 = inlined_call_operand.hbm [shape: f32[8,512], index: 2, kind: output, shape index: {}]  }
   0x1   :  { %8 = vsyncpa [#allocation6], 0 }
   0x2   :  { %9 = vsyncpa [#allocation4], 0  ;;  %s15_s11 = sshll.u32 %s198_s0, 4  ;;  %s171_s12 = smov [#allocation2]   ;;  %s16_s11 = int_to_ptr.hbm [resolvable:$true] %s15_s11 }
   0x3   :  { %s17_s13 = sshll.u32 %s171_s12, 4  ;;  %s26_s16 = sshll.u32 %s199_s1, 4  ;;  %s18_s13 = int_to_ptr.vmem [resolvable:$true] %s17_s13  ;;  %s27_s16 = int_to_ptr.hbm [resolvable:$true] %s26_s16 }
   0x4   :  { %20 = dma.hbm_to_vmem [thread:$0]  %s16_s11, 512, %s18_s13, [#allocation3]  }
   0x5   :  { %s172_s17 = smov [#allocation5]  }
   0x6   :  { %s28_s18 = sshll.u32 %s172_s17, 4  ;;  %s29_s18 = int_to_ptr.vmem [resolvable:$true] %s28_s18 }
   0x7   :  { %31 = dma.hbm_to_vmem [thread:$0]  %s27_s16, 512, %s29_s18, [#allocation6]  }
   0x8   :  { %165 = dma.done.wait [#allocation3], 512  }
   0x9   :  { %166 = vsyncadd [#allocation3], 4294966784 }
   0xa   :  { %167 = dma.done.wait [#allocation6], 512  }
   0xb   :  { %168 = vsyncadd [#allocation6], 4294966784  ;;  %v44_v0 = vld [vmem:[#allocation5] sm:$0xff]  ;;  %v45_v1 = vld [vmem:[#allocation5 + $0x8] sm:$0xff]  ;;  %s173_s0 = smov [#allocation7]   ;;  %s71_s21 = sshll.u32 %s200_s2, 4  ;;  %s72_s21 = int_to_ptr.hbm [resolvable:$true] %s71_s21 }
   0xc   :  { %85 = vtanh.f32 %v44_v0  ;;  %v46_v2 = vld [vmem:[#allocation5 + $0x10] sm:$0xff]  ;;  %v47_v3 = vld [vmem:[#allocation5 + $0x18] sm:$0xff]  ;;  %v40_v5 = vld [vmem:[#allocation2] sm:$0xff]  ;;  %s69_s1 = sshll.u32 %s173_s0, 4  ;;  %s70_s1 = int_to_ptr.vmem [resolvable:$true] %s69_s1 }
   0xd   :  { %87 = vtanh.f32 %v45_v1  ;;  %v41_v8 = vld [vmem:[#allocation2 + $0x8] sm:$0xff]  ;;  %v42_v11 = vld [vmem:[#allocation2 + $0x10] sm:$0xff]  ;;  %v43_v15 = vld [vmem:[#allocation2 + $0x18] sm:$0xff] }
   0xe   :  { %89 = vtanh.f32 %v46_v2 }
   0xf   :  { %91 = vtanh.f32 %v47_v3 }
  0x12   :  { %v86_v4 = vpop.eup %85 }
  0x13   :  { %v88_v6 = vpop.eup %87  ;;  %v52_v7 = vmul.f32 0.25, %v86_v4 }
  0x14   :  { %v90_v9 = vpop.eup %89  ;;  %v53_v10 = vmul.f32 0.25, %v88_v6 }
  0x15   :  { %v92_v12 = vpop.eup %91  ;;  %v56_v13 = vadd.f32 %v52_v7, %v40_v5  ;;  %v54_v14 = vmul.f32 0.25, %v90_v9 }
  0x16   :  { %v57_v16 = vadd.f32 %v53_v10, %v41_v8  ;;  %v55_v17 = vmul.f32 0.25, %v92_v12 }
  0x17   :  { %60 = vst [vmem:[#allocation7] sm:$0xff] %v56_v13  ;;  %v58_v18 = vadd.f32 %v54_v14, %v42_v11 }
  0x18   :  { %61 = vst [vmem:[#allocation7 + $0x8] sm:$0xff] %v57_v16  ;;  %v59_v19 = vadd.f32 %v55_v17, %v43_v15 }
  0x19   :  { %62 = vst [vmem:[#allocation7 + $0x10] sm:$0xff] %v58_v18 }
  0x1a   :  { %63 = vst [vmem:[#allocation7 + $0x18] sm:$0xff] %v59_v19 }
  0x1b   :  { %74 = dma.vmem_to_hbm [thread:$0]  %s70_s1, 512, %s72_s21, [#allocation4]  }
  0x1c   :  { %169 = dma.done.wait [#allocation4], 512  }
  0x1d   :  { %170 = vsyncadd [#allocation4], 4294966784 }
  0x1e   :  { %79 = vsyncpa [#allocation3], 1 }
  0x1f   :  { %80 = vsyncpa [#allocation6], 1 }
  0x20   :  { %81 = vsyncpa [#allocation4], 1 }

</bundles_post_ra>
